<compile_context>
chip_gen: v5e
topology: v5e:2x2
jax: 0.10.0
libtpu: 0.0.40
codegen_flags: <defaults>
</compile_context>

<pallas_src>
import functools

import jax
import jax.numpy as jnp
from jax.experimental import pallas as pl
from jax.experimental.pallas import tpu as pltpu

F32 = jnp.float32
LEAKY = 0.01    # torch.nn.LeakyReLU default negative_slope
BN_EPS = 1e-5   # torch.nn.BatchNorm2d default eps


def _channel_se_kernel(x_ref, p_ref, b1_ref, o_ref, *, cr, inv_hw):
    """Processes a (Bt, C, HWp) batch-tile per grid step.

    x_ref / o_ref : (Bt, C, HWp)   lane axis = padded H*W (lane-dense stores)
    p_ref         : (C, 2*Cr + 3)  packed params:
                      [:, 0:Cr]          fc1 weight transposed (C, Cr)
                      [:, Cr:2Cr]        fc2 weight            (C, Cr)
                      [:, 2Cr]           fc2 bias              (C, 1)
                      [:, 2Cr+1]         folded BN scale       (C, 1)
                      [:, 2Cr+2]         folded BN shift       (C, 1)
    b1_ref        : (1, Cr)        fc1 bias
    """
    p = p_ref[...].astype(F32)                       # (C, 2Cr+3), tiny
    w1t = p[:, 0:cr]                                 # (C, Cr)
    w2 = p[:, cr:2 * cr]                             # (C, Cr)
    b2 = p[:, 2 * cr:2 * cr + 1]                     # (C, 1)
    scale = p[:, 2 * cr + 1:2 * cr + 2]              # (C, 1)
    shift = p[:, 2 * cr + 2:2 * cr + 3]              # (C, 1)
    b1 = b1_ref[...].astype(F32)                     # (1, Cr)

    # ---- Squeeze: global average pool, batched over Bt (XLU lane reduce).
    # Padded lanes are zero, so sum * (1/true_HW) is exact.
    xf = x_ref[...].astype(F32)                      # (Bt, C, HWp)
    pooled = jnp.sum(xf, axis=-1, keepdims=True) * inv_hw       # (Bt, C, 1)

    # ---- Excite: fc1 -> LeakyReLU -> fc2 -> sigmoid.  Shapes are far too
    # small for the MXU; keep on VPU (mul) + XLU (reduce), batched over Bt.
    h = jnp.sum(pooled * w1t[None, :, :], axis=1, keepdims=True)  # (Bt, 1, Cr)
    h = h + b1[None, :, :]
    h = jnp.maximum(h, LEAKY * h)                                 # LeakyReLU
    g = jnp.sum(h * w2[None, :, :], axis=-1, keepdims=True)       # (Bt, C, 1)
    gate = jax.nn.sigmoid(g + b2[None, :, :])                     # (Bt, C, 1)

    # ---- Gate * folded BN * LeakyReLU, broadcast along lanes in-register.
    # Re-read x_ref (cheap VMEM vld) instead of keeping xf live -> bounded
    # vreg pressure even for large Bt*HWp tiles.
    gs = gate * scale[None, :, :]                                 # (Bt, C, 1)
    y = x_ref[...].astype(F32) * gs + shift[None, :, :]
    o_ref[...] = jnp.maximum(y, LEAKY * y).astype(o_ref.dtype)


def channel_se_layer(x_nchw, params):
    """ChannelSELayer forward.  x: (B, C, H, W) -> (B, C, H, W), x.dtype."""
    B, C, H, W = x_nchw.shape
    HW = H * W
    HWp = ((HW + 127) // 128) * 128          # lane-dense last dim
    Cr = params["w1"].shape[0]
    dtype = x_nchw.dtype

    x = x_nchw.reshape(B, C, HW)
    if HWp != HW:
        x = jnp.pad(x, ((0, 0), (0, 0), (0, HWp - HW)))

    # Fold running-stat BatchNorm into a per-channel scale/shift (eval mode).
    # TODO(synk): training-mode batch statistics are not implemented.
    scale = params["bn_gamma"] * jax.lax.rsqrt(params["bn_var"] + BN_EPS)
    shift = params["bn_beta"] - params["bn_mean"] * scale

    packed = jnp.concatenate(
        [params["w1"].T.astype(F32),                 # (C, Cr)
         params["w2"].astype(F32),                   # (C, Cr)
         params["b2"].reshape(C, 1).astype(F32),     # (C, 1)
         scale.reshape(C, 1).astype(F32),            # (C, 1)
         shift.reshape(C, 1).astype(F32)],           # (C, 1)
        axis=1)                                      # (C, 2*Cr + 3)
    b1 = params["b1"].reshape(1, Cr).astype(F32)

    # Batch-tile size: biggest Bt whose double-buffered in+out blocks fit a
    # ~20 MiB budget (v7x-safe), while keeping >= 2 grid steps so the
    # parallel axis can be sharded across both v7x TensorCores.
    itemsize = jnp.dtype(dtype).itemsize
    per_elem_bytes = C * HWp * itemsize
    budget = 20 * 1024 * 1024
    bt = max(1, budget // (4 * per_elem_bytes))
    if B >= 2:
        bt = min(bt, pl.cdiv(B, 2))
    bt = min(bt, B)
    grid = (pl.cdiv(B, bt),)

    out = pl.pallas_call(
        functools.partial(_channel_se_kernel, cr=Cr, inv_hw=1.0 / HW),
        out_shape=jax.ShapeDtypeStruct((B, C, HWp), dtype),
        grid=grid,
        in_specs=[
            pl.BlockSpec((bt, C, HWp), lambda b: (b, 0, 0)),     # x tile
            pl.BlockSpec((C, 2 * Cr + 3), lambda b: (0, 0)),     # packed params
            pl.BlockSpec((1, Cr), lambda b: (0, 0)),             # fc1 bias
        ],
        out_specs=pl.BlockSpec((bt, C, HWp), lambda b: (b, 0, 0)),
        compiler_params=pltpu.CompilerParams(
            dimension_semantics=("parallel",),
            vmem_limit_bytes=28 * 1024 * 1024),
    )(x, packed, b1)

    if HWp != HW:
        out = out[:, :, :HW]
    return out.reshape(B, C, H, W)


def channel_se_reference(x, params):
    """Pure-JAX reference (eval-mode BN) for correctness checking."""
    pooled = jnp.mean(x.astype(F32), axis=(2, 3))                 # (B, C)
    h = pooled @ params["w1"].T + params["b1"]
    h = jnp.where(h >= 0, h, LEAKY * h)
    g = h @ params["w2"].T + params["b2"]
    gate = jax.nn.sigmoid(g)
    y = x.astype(F32) * gate[:, :, None, None]
    scale = params["bn_gamma"] * jax.lax.rsqrt(params["bn_var"] + BN_EPS)
    shift = params["bn_beta"] - params["bn_mean"] * scale
    y = y * scale[None, :, None, None] + shift[None, :, None, None]
    return jnp.where(y >= 0, y, LEAKY * y)


def _make_params(key, C, Cr):
    ks = jax.random.split(key, 8)
    return dict(
        w1=0.2 * jax.random.normal(ks[0], (Cr, C), F32),          # fc1.weight
        b1=0.1 * jax.random.normal(ks[1], (Cr,), F32),            # fc1.bias
        w2=0.2 * jax.random.normal(ks[2], (C, Cr), F32),          # fc2.weight
        b2=0.1 * jax.random.normal(ks[3], (C,), F32),             # fc2.bias
        bn_gamma=jax.random.uniform(ks[4], (C,), F32, 0.5, 1.5),
        bn_beta=0.1 * jax.random.normal(ks[5], (C,), F32),
        bn_mean=0.1 * jax.random.normal(ks[6], (C,), F32),
        bn_var=jax.random.uniform(ks[7], (C,), F32, 0.5, 1.5),
    )


if __name__ == "__main__":
    key = jax.random.PRNGKey(0)
    kp, kx1, kx2 = jax.random.split(key, 3)

    C = 64
    Cr = C // 8                     # reduction_ratio = 8
    params = _make_params(kp, C, Cr)
    fwd = jax.jit(channel_se_layer)

    # Primary check: H*W is already a multiple of 128, Bt=2 per grid step.
    B, H, W = 4, 16, 16
    x = jax.random.normal(kx1, (B, C, H, W), F32)
    out = fwd(x, params)
    jax.block_until_ready(out)
    ref = channel_se_reference(x, params)
    assert out.shape == x.shape
    assert bool(jnp.all(jnp.isfinite(out)))
    err = float(jnp.max(jnp.abs(out.astype(F32) - ref)))
    assert err < 1e-4, f"max abs error vs reference: {err}"

    # Secondary check: odd H*W exercises the lane-padding / crop path.
    B2, H2, W2 = 2, 10, 10
    x2 = jax.random.normal(kx2, (B2, C, H2, W2), F32)
    out2 = fwd(x2, params)
    jax.block_until_ready(out2)
    ref2 = channel_se_reference(x2, params)
    err2 = float(jnp.max(jnp.abs(out2.astype(F32) - ref2)))
    assert out2.shape == x2.shape
    assert err2 < 1e-4, f"max abs error vs reference (padded HW): {err2}"

    print("KERNEL_OK")
</pallas_src>

<mosaic_0001>
module attributes {stable_mosaic.version = 11 : i64} {
  func.func @_channel_se_kernel(%arg0: i32, %arg1: memref<2x64x256xf32, #tpu.memory_space<vmem>>, %arg2: memref<64x19xf32, #tpu.memory_space<vmem>>, %arg3: memref<1x8xf32, #tpu.memory_space<vmem>>, %arg4: memref<2x64x256xf32, #tpu.memory_space<vmem>>) attributes {dimension_semantics = [#tpu.dimension_semantics<parallel>], iteration_bounds = array<i64: 2>, scalar_prefetch = 0 : i64, scratch_operands = 0 : i64, tpu.core_type = #tpu.core_type<tc>, window_params = [{transform_indices = @transform_0, window_bounds = array<i64: 2, 64, 256>}, {pipeline_mode = #tpu.pipeline_mode<synchronous>, transform_indices = @transform_1, window_bounds = array<i64: 64, 19>}, {pipeline_mode = #tpu.pipeline_mode<synchronous>, transform_indices = @transform_2, window_bounds = array<i64: 1, 8>}, {transform_indices = @transform_3, window_bounds = array<i64: 2, 64, 256>}]} {
    %c0 = arith.constant 0 : index
    %c0_0 = arith.constant 0 : index
    %0 = vector.load %arg2[%c0, %c0_0] : memref<64x19xf32, #tpu.memory_space<vmem>>, vector<64x19xf32>
    %1 = vector.extract_strided_slice %0 {offsets = [0, 0], sizes = [64, 8], strides = [1, 1]} : vector<64x19xf32> to vector<64x8xf32>
    %2 = vector.extract_strided_slice %0 {offsets = [0, 8], sizes = [64, 8], strides = [1, 1]} : vector<64x19xf32> to vector<64x8xf32>
    %3 = vector.extract_strided_slice %0 {offsets = [0, 16], sizes = [64, 1], strides = [1, 1]} : vector<64x19xf32> to vector<64x1xf32>
    %4 = vector.extract_strided_slice %0 {offsets = [0, 17], sizes = [64, 1], strides = [1, 1]} : vector<64x19xf32> to vector<64x1xf32>
    %5 = vector.extract_strided_slice %0 {offsets = [0, 18], sizes = [64, 1], strides = [1, 1]} : vector<64x19xf32> to vector<64x1xf32>
    %c0_1 = arith.constant 0 : index
    %c0_2 = arith.constant 0 : index
    %6 = vector.load %arg3[%c0_1, %c0_2] : memref<1x8xf32, #tpu.memory_space<vmem>>, vector<1x8xf32>
    %c0_3 = arith.constant 0 : index
    %c0_4 = arith.constant 0 : index
    %c0_5 = arith.constant 0 : index
    %7 = vector.load %arg1[%c0_3, %c0_4, %c0_5] : memref<2x64x256xf32, #tpu.memory_space<vmem>>, vector<2x64x256xf32>
    %cst = arith.constant dense<0.000000e+00> : vector<2x64xf32>
    %8 = vector.multi_reduction <add>, %7, %cst [2] : vector<2x64x256xf32> to vector<2x64xf32>
    %9 = vector.shape_cast %8 : vector<2x64xf32> to vector<2x64x1xf32>
    %cst_6 = arith.constant 3.906250e-03 : f32
    %10 = vector.broadcast %cst_6 : f32 to vector<2x64x1xf32>
    %11 = arith.mulf %9, %10 : vector<2x64x1xf32>
    %12 = vector.shape_cast %1 : vector<64x8xf32> to vector<1x64x8xf32>
    %13 = vector.broadcast %11 : vector<2x64x1xf32> to vector<2x64x8xf32>
    %14 = vector.broadcast %12 : vector<1x64x8xf32> to vector<2x64x8xf32>
    %15 = arith.mulf %13, %14 : vector<2x64x8xf32>
    %cst_7 = arith.constant dense<0.000000e+00> : vector<2x8xf32>
    %16 = vector.multi_reduction <add>, %15, %cst_7 [1] : vector<2x64x8xf32> to vector<2x8xf32>
    %17 = vector.shape_cast %16 : vector<2x8xf32> to vector<2x1x8xf32>
    %18 = vector.shape_cast %6 : vector<1x8xf32> to vector<1x1x8xf32>
    %19 = vector.broadcast %18 : vector<1x1x8xf32> to vector<2x1x8xf32>
    %20 = arith.addf %17, %19 : vector<2x1x8xf32>
    %cst_8 = arith.constant 0.00999999977 : f32
    %21 = vector.broadcast %cst_8 : f32 to vector<2x1x8xf32>
    %22 = arith.mulf %21, %20 : vector<2x1x8xf32>
    %23 = arith.maximumf %20, %22 : vector<2x1x8xf32>
    %24 = vector.shape_cast %2 : vector<64x8xf32> to vector<1x64x8xf32>
    %25 = vector.broadcast %23 : vector<2x1x8xf32> to vector<2x64x8xf32>
    %26 = vector.broadcast %24 : vector<1x64x8xf32> to vector<2x64x8xf32>
    %27 = arith.mulf %25, %26 : vector<2x64x8xf32>
    %cst_9 = arith.constant dense<0.000000e+00> : vector<2x64xf32>
    %28 = vector.multi_reduction <add>, %27, %cst_9 [2] : vector<2x64x8xf32> to vector<2x64xf32>
    %29 = vector.shape_cast %28 : vector<2x64xf32> to vector<2x64x1xf32>
    %30 = vector.shape_cast %3 : vector<64x1xf32> to vector<1x64x1xf32>
    %31 = vector.broadcast %30 : vector<1x64x1xf32> to vector<2x64x1xf32>
    %32 = arith.addf %29, %31 : vector<2x64x1xf32>
    %33 = arith.negf %32 : vector<2x64x1xf32>
    %34 = math.exp %33 : vector<2x64x1xf32>
    %cst_10 = arith.constant 1.000000e+00 : f32
    %35 = vector.broadcast %cst_10 : f32 to vector<2x64x1xf32>
    %36 = arith.addf %35, %34 : vector<2x64x1xf32>
    %37 = arith.divf %35, %36 : vector<2x64x1xf32>
    %38 = vector.shape_cast %4 : vector<64x1xf32> to vector<1x64x1xf32>
    %39 = vector.broadcast %38 : vector<1x64x1xf32> to vector<2x64x1xf32>
    %40 = arith.mulf %37, %39 : vector<2x64x1xf32>
    %c0_11 = arith.constant 0 : index
    %c0_12 = arith.constant 0 : index
    %c0_13 = arith.constant 0 : index
    %41 = vector.load %arg1[%c0_11, %c0_12, %c0_13] : memref<2x64x256xf32, #tpu.memory_space<vmem>>, vector<2x64x256xf32>
    %42 = vector.broadcast %40 : vector<2x64x1xf32> to vector<2x64x256xf32>
    %43 = arith.mulf %41, %42 : vector<2x64x256xf32>
    %44 = vector.shape_cast %5 : vector<64x1xf32> to vector<1x64x1xf32>
    %45 = vector.broadcast %44 : vector<1x64x1xf32> to vector<2x64x256xf32>
    %46 = arith.addf %43, %45 : vector<2x64x256xf32>
    %cst_14 = arith.constant 0.00999999977 : f32
    %47 = vector.broadcast %cst_14 : f32 to vector<2x64x256xf32>
    %48 = arith.mulf %47, %46 : vector<2x64x256xf32>
    %49 = arith.maximumf %46, %48 : vector<2x64x256xf32>
    %c0_15 = arith.constant 0 : index
    %c0_16 = arith.constant 0 : index
    %c0_17 = arith.constant 0 : index
    %50 = vector.load %arg4[%c0_15, %c0_16, %c0_17] : memref<2x64x256xf32, #tpu.memory_space<vmem>>, vector<2x64x256xf32>
    tpu.vector_store %arg4[%c0_15, %c0_16, %c0_17], %49 {strides = array<i32>} : memref<2x64x256xf32, #tpu.memory_space<vmem>>, vector<2x64x256xf32>,
    return
  }
  func.func @transform_0(%arg0: i32) -> (i32, i32, i32) {
    %c0_i32 = arith.constant 0 : i32
    %c0_i32_0 = arith.constant 0 : i32
    %c0_i32_1 = arith.constant 0 : i32
    return %arg0, %c0_i32, %c0_i32_0 : i32, i32, i32
  }
  func.func @transform_1(%arg0: i32) -> (i32, i32) {
    %c0_i32 = arith.constant 0 : i32
    %c0_i32_0 = arith.constant 0 : i32
    %c0_i32_1 = arith.constant 0 : i32
    return %c0_i32, %c0_i32_0 : i32, i32
  }
  func.func @transform_2(%arg0: i32) -> (i32, i32) {
    %c0_i32 = arith.constant 0 : i32
    %c0_i32_0 = arith.constant 0 : i32
    %c0_i32_1 = arith.constant 0 : i32
    return %c0_i32, %c0_i32_0 : i32, i32
  }
  func.func @transform_3(%arg0: i32) -> (i32, i32, i32) {
    %c0_i32 = arith.constant 0 : i32
    %c0_i32_0 = arith.constant 0 : i32
    %c0_i32_1 = arith.constant 0 : i32
    return %arg0, %c0_i32, %c0_i32_0 : i32, i32, i32
  }
}

</mosaic_0001>

<bundles_post_ra>
// kernel: channel_se_layer.1
= control target key start
LH: loop header
LB: loop body
LE: loop exit
PB: predicated region body
PF: predicated region fallthrough
CT: control target
= control target key end

     0   :  { %s1320_s12 = smov 0   ;;  %s2013_s0 = inlined_call_operand.vmem [shape: f32[4,64,256], index: 0, kind: input, shape index: {}]   ;;  %s2014_s1 = inlined_call_operand.vmem [shape: f32[64,19], index: 1, kind: input, shape index: {}]   ;;  %s2015_s2 = inlined_call_operand.vmem [shape: f32[1,8], index: 2, kind: input, shape index: {}]   ;;  %s2016_s3 = inlined_call_operand.vmem [shape: f32[4,64,256], index: 3, kind: output, shape index: {}]  }
   0x1 LB: > { %s1137_s13 = sadd.s32 4294967295, %s1294_s12   ;;  %p1141_p0 = scmp.ge.s32.totalorder %s1294_s12, 1  ;;  %s1294_s12 = sphi %s1320_s12, %s13_s12  }
   0x2   : > { %p139_p1 = scmp.lt.s32.totalorder %s1294_s12, 3 }
   0x4   : > { %p140_p2 = pnand %p1141_p0, %p139_p1 }
   0x5   : > { %s1142_s14 = sshll.u32 (!%p140_p2), %s1137_s13, 1  ;;  %s1296_s23 = smov (!%p140_p2), 120  }
   0x6   : > { %143 = sbr.rel (%p140_p2) target bundleno = 541 (0x21d), region = 32  ;;  %p166_p3 = scmp.lt.s32.totalorder (!%p140_p2), %s1142_s14, 3 }
   0x7   : > { %s1297_s11 = smov (!%p140_p2), 127  }
   0xb   : > { %s2052_s14 = smov (!%p166_p3, %s1142_s14), 3  ;;  %v1373_v48 = vld [vmem:[%s2014_s1 + $0x8] sm:$0xff]  ;;  %v1378_v49 = vld [vmem:[%s2014_s1] sm:$0xff]  ;;  %v1385_v50 = vld [vmem:[%s2014_s1 + $0x10] sm:$0xff]  ;;  %vm300_vm0 = vcmask 64512  }
   0xc   : > { %s1166_s15 = sshll.u32 %s2052_s14, 7  ;;  %v1391_v51 = vld [vmem:[%s2014_s1 + $0x18] sm:$0xff]  ;;  %v1396_v52 = vld [vmem:[%s2014_s1 + $0x20] sm:$0xff]  ;;  %v1403_v53 = vld [vmem:[%s2014_s1 + $0x28] sm:$0xff] }
   0xd   : > { %s1336_s18 = scalar_lea.vmem %s2013_s0, %s1166_s15  ;;  %v1409_v54 = vld [vmem:[%s2014_s1 + $0x30] sm:$0xff]  ;;  %v1414_v55 = vld [vmem:[%s2014_s1 + $0x38] sm:$0xff]  ;;  %s1922_s24 = scalar_lea.vmem %s2016_s3, %s1166_s15 }
   0xe   : > { %v196_v0 = vld [vmem:[%s1336_s18 + $0x40] sm:$0xff]  ;;  %v197_v1 = vld [vmem:[%s1336_s18 + $0x48] sm:$0xff]  ;;  %v198_v9 = vld [vmem:[%s1336_s18 + $0x50] sm:$0xff] }
   0xf   : > { %v192_v2 = vld [vmem:[%s1336_s18 + $0x20] sm:$0xff]  ;;  %v232_v3 = vadd.f32 %v197_v1, %v196_v0  ;;  %v193_v4 = vld [vmem:[%s1336_s18 + $0x28] sm:$0xff]  ;;  %v199_v10 = vld [vmem:[%s1336_s18 + $0x58] sm:$0xff] }
  0x10   : > { %v188_v5 = vld [vmem:[%s1336_s18] sm:$0xff]  ;;  %v189_v6 = vld [vmem:[%s1336_s18 + $0x8] sm:$0xff]  ;;  %v226_v7 = vadd.f32 %v193_v4, %v192_v2  ;;  %v194_v11 = vld [vmem:[%s1336_s18 + $0x30] sm:$0xff]  ;;  %v235_v15 = vadd.f32 %v199_v10, %v198_v9 }
  0x11   : > { %v220_v8 = vadd.f32 %v189_v6, %v188_v5  ;;  %233 = vadd.xlane.f32.xlu2 %v232_v3  ;;  %v195_v12 = vld [vmem:[%s1336_s18 + $0x38] sm:$0xff]  ;;  %v190_v13 = vld [vmem:[%s1336_s18 + $0x10] sm:$0xff]  ;;  %v204_v18 = vld [vmem:[%s1336_s18 + $0x80] sm:$0xff] }
  0x12   : > { %227 = vadd.xlane.f32.xlu1 %v226_v7  ;;  %v191_v14 = vld [vmem:[%s1336_s18 + $0x18] sm:$0xff]  ;;  %v229_v16 = vadd.f32 %v195_v12, %v194_v11  ;;  %v205_v19 = vld [vmem:[%s1336_s18 + $0x88] sm:$0xff]  ;;  %v202_v20 = vld [vmem:[%s1336_s18 + $0x70] sm:$0xff] }
  0x13   : > { %221 = vadd.xlane.f32.xlu0 %v220_v8  ;;  %v223_v17 = vadd.f32 %v191_v14, %v190_v13  ;;  %v203_v21 = vld [vmem:[%s1336_s18 + $0x78] sm:$0xff]  ;;  %v200_v22 = vld [vmem:[%s1336_s18 + $0x60] sm:$0xff]  ;;  %v201_v23 = vld [vmem:[%s1336_s18 + $0x68] sm:$0xff]  ;;  %v244_v24 = vadd.f32 %v205_v19, %v204_v18 }
  0x14   : > { %v241_v25 = vadd.f32 %v203_v21, %v202_v20  ;;  %v238_v26 = vadd.f32 %v201_v23, %v200_v22  ;;  %v210_v27 = vld [vmem:[%s1336_s18 + $0xb0] sm:$0xff]  ;;  %v211_v28 = vld [vmem:[%s1336_s18 + $0xb8] sm:$0xff]  ;;  %v208_v29 = vld [vmem:[%s1336_s18 + $0xa0] sm:$0xff] }
  0x15   : > { %v209_v30 = vld [vmem:[%s1336_s18 + $0xa8] sm:$0xff]  ;;  %v206_v31 = vld [vmem:[%s1336_s18 + $0x90] sm:$0xff]  ;;  %v207_v32 = vld [vmem:[%s1336_s18 + $0x98] sm:$0xff]  ;;  %v253_v33 = vadd.f32 %v211_v28, %v210_v27 }
  0x16   : > { %v250_v34 = vadd.f32 %v209_v30, %v208_v29  ;;  %v247_v35 = vadd.f32 %v207_v32, %v206_v31  ;;  %v216_v36 = vld [vmem:[%s1336_s18 + $0xe0] sm:$0xff]  ;;  %v217_v37 = vld [vmem:[%s1336_s18 + $0xe8] sm:$0xff]  ;;  %v214_v38 = vld [vmem:[%s1336_s18 + $0xd0] sm:$0xff] }
  0x17   : > { %v215_v39 = vld [vmem:[%s1336_s18 + $0xd8] sm:$0xff]  ;;  %v212_v40 = vld [vmem:[%s1336_s18 + $0xc0] sm:$0xff]  ;;  %v213_v41 = vld [vmem:[%s1336_s18 + $0xc8] sm:$0xff]  ;;  %v262_v42 = vadd.f32 %v217_v37, %v216_v36 }
  0x18   : > { %v259_v43 = vadd.f32 %v215_v39, %v214_v38  ;;  %v256_v44 = vadd.f32 %v213_v41, %v212_v40  ;;  %v218_v45 = vld [vmem:[%s1336_s18 + $0xf0] sm:$0xff]  ;;  %v219_v46 = vld [vmem:[%s1336_s18 + $0xf8] sm:$0xff] }
  0x19   : > { %236 = vadd.xlane.f32.xlu2 %v235_v15  ;;  %v265_v47 = vadd.f32 %v219_v46, %v218_v45 }
  0x1a   : > { %230 = vadd.xlane.f32.xlu1 %v229_v16 }
  0x1b   : > { %224 = vadd.xlane.f32.xlu0 %v223_v17 }
  0x21   : > { %245 = vadd.xlane.f32.xlu2 %v244_v24 }
  0x22   : > { %242 = vadd.xlane.f32.xlu1 %v241_v25 }
  0x23   : > { %239 = vadd.xlane.f32.xlu0 %v238_v26 }
  0x29   : > { %254 = vadd.xlane.f32.xlu2 %v253_v33 }
  0x2a   : > { %251 = vadd.xlane.f32.xlu1 %v250_v34 }
  0x2b   : > { %248 = vadd.xlane.f32.xlu0 %v247_v35 }
  0x31   : > { %263 = vadd.xlane.f32.xlu2 %v262_v42 }
  0x32   : > { %260 = vadd.xlane.f32.xlu1 %v259_v43 }
  0x33   : > { %257 = vadd.xlane.f32.xlu0 %v256_v44 }
  0x3b   : > { %266 = vadd.xlane.f32.xlu0 %v265_v47 }
  0x49   : > { %361 = vrot.lane.b32.xlu2 %v1373_v48, %s1296_s23 }
  0x4b   : > { %359 = vrot.lane.b32.xlu1 %v1378_v49, %s1296_s23 }
  0x4f   : > { %363 = vrot.lane.b32.xlu0 %v1385_v50, %s1296_s23 }
  0x51   : > { %365 = vrot.lane.b32.xlu2 %v1391_v51, %s1296_s23 }
  0x53   : > { %367 = vrot.lane.b32.xlu1 %v1396_v52, %s1296_s23 }
  0x57   : > { %369 = vrot.lane.b32.xlu0 %v1403_v53, %s1296_s23 }
  0x59   : > { %371 = vrot.lane.b32.xlu2 %v1409_v54, %s1296_s23 }
  0x5b   : > { %373 = vrot.lane.b32.xlu1 %v1414_v55, %s1296_s23 }
  0x84   : > { %v234_v56 = vpop.xlane.xlu2 %233 }
  0x85   : > { %v228_v57 = vpop.xlane.xlu1 %227  ;;  %v272_v0 = vmul.f32 0.00390625, %v234_v56 }
  0x86   : > { %v222_v58 = vpop.xlane.xlu0 %221  ;;  %v270_v60 = vmul.f32 0.00390625, %v228_v57 }
  0x87   : > { %v268_v59 = vmul.f32 0.00390625, %v222_v58  ;;  %v288_v7 = vmul.f32 %v272_v0, %v1396_v52 }
  0x88   : > { %v286_v4 = vmul.f32 %v270_v60, %v1385_v50 }
  0x89   : > { %v284_v1 = vmul.f32 %v268_v59, %v1378_v49  ;;  %v308_v18 = vsel %vm300_vm0, %v288_v7, 0.0  ;;  %v187_v7 = vld [vmem:[%s2015_s2] sm:$0x1] }
  0x8a   : > { %v304_v12 = vsel %vm300_vm0, %v286_v4, 0.0 }
  0x8b   : > { %v301_v8 = vsel %vm300_vm0, %v284_v1, 0.0 }
  0x8c   : > { %v237_v61 = vpop.xlane.xlu2 %236 }
  0x8d   : > { %v231_v62 = vpop.xlane.xlu1 %230  ;;  %v273_v5 = vmul.f32 0.00390625, %v237_v61 }
  0x8e   : > { %v225_v63 = vpop.xlane.xlu0 %224  ;;  %v271_v2 = vmul.f32 0.00390625, %v231_v62 }
  0x8f   : > { %v269_v3 = vmul.f32 0.00390625, %v225_v63  ;;  %v289_v13 = vmul.f32 %v273_v5, %v1403_v53 }
  0x90   : > { %v287_v9 = vmul.f32 %v271_v2, %v1391_v51 }
  0x91   : > { %v285_v6 = vmul.f32 %v269_v3, %v1373_v48  ;;  %v310_v23 = vsel %vm300_vm0, %v289_v13, 0.0 }
  0x92   : > { %v306_v19 = vsel %vm300_vm0, %v287_v9, 0.0 }
  0x93   : > { %v302_v10 = vsel %vm300_vm0, %v285_v6, 0.0 }
  0x94   : > { %v303_v11 = vadd.f32 %v302_v10, %v301_v8  ;;  %v246_v14 = vpop.xlane.xlu2 %245 }
  0x95   : > { %v243_v16 = vpop.xlane.xlu1 %242  ;;  %v276_v24 = vmul.f32 0.00390625, %v246_v14 }
  0x96   : > { %v305_v15 = vadd.f32 %v304_v12, %v303_v11  ;;  %v240_v17 = vpop.xlane.xlu0 %239  ;;  %v275_v20 = vmul.f32 0.00390625, %v243_v16 }
  0x97   : > { %v274_v21 = vmul.f32 0.00390625, %v240_v17  ;;  %v292_v29 = vmul.f32 %v276_v24, %v1378_v49 }
  0x98   : > { %v307_v22 = vadd.f32 %v306_v19, %v305_v15  ;;  %v291_v27 = vmul.f32 %v275_v20, %v1414_v55 }
  0x99   : > { %v290_v25 = vmul.f32 %v274_v21, %v1409_v54  ;;  %v322_v40 = vsel %vm300_vm0, %v292_v29, 0.0 }
  0x9a   : > { %v309_v26 = vadd.f32 %v308_v18, %v307_v22  ;;  %v314_v35 = vsel %vm300_vm0, %v291_v27, 0.0 }
  0x9b   : > { %v312_v30 = vsel %vm300_vm0, %v290_v25, 0.0 }
  0x9c   : > { %v311_v28 = vadd.f32 %v310_v23, %v309_v26  ;;  %v255_v31 = vpop.xlane.xlu2 %254 }
  0x9d   : > { %v252_v33 = vpop.xlane.xlu1 %251  ;;  %v279_v36 = vmul.f32 0.00390625, %v255_v31 }
  0x9e   : > { %v313_v32 = vadd.f32 %v312_v30, %v311_v28  ;;  %v249_v34 = vpop.xlane.xlu0 %248  ;;  %v278_v37 = vmul.f32 0.00390625, %v252_v33 }
  0x9f   : > { %v277_v38 = vmul.f32 0.00390625, %v249_v34  ;;  %v295_v44 = vmul.f32 %v279_v36, %v1391_v51 }
  0xa0   : > { %v315_v39 = vadd.f32 %v314_v35, %v313_v32  ;;  %v294_v41 = vmul.f32 %v278_v37, %v1385_v50 }
  0xa1   : > { %v293_v42 = vmul.f32 %v277_v38, %v1373_v48  ;;  %v327_v62 = vsel %vm300_vm0, %v295_v44, 0.0 }
  0xa2   : > { %v316_v43 = vrot.slane %v315_v39, 4  ;;  %v325_v56 = vsel %vm300_vm0, %v294_v41, 0.0 }
  0xa3   : > { %v323_v45 = vsel %vm300_vm0, %v293_v42, 0.0 }
  0xa4   : > { %v317_v46 = vadd.f32 %v316_v43, %v315_v39  ;;  %v324_v47 = vadd.f32 %v323_v45, %v322_v40  ;;  %v264_v57 = vpop.xlane.xlu2 %263 }
  0xa5   : > { %v261_v60 = vpop.xlane.xlu1 %260  ;;  %v282_v63 = vmul.f32 0.00390625, %v264_v57 }
  0xa6   : > { %v318_v58 = vrot.slane %v317_v46, 2  ;;  %v326_v59 = vadd.f32 %v325_v56, %v324_v47  ;;  %v258_v61 = vpop.xlane.xlu0 %257  ;;  %v281_v0 = vmul.f32 0.00390625, %v261_v60 }
  0xa7   : > { %v280_v1 = vmul.f32 0.00390625, %v258_v61  ;;  %v298_v8 = vmul.f32 %v282_v63, %v1409_v54 }
  0xa8   : > { %v319_v2 = vadd.f32 %v318_v58, %v317_v46  ;;  %v297_v3 = vmul.f32 %v281_v0, %v1403_v53  ;;  %v328_v6 = vadd.f32 %v327_v62, %v326_v59 }
  0xa9   : > { %v296_v4 = vmul.f32 %v280_v1, %v1396_v52  ;;  %v333_v16 = vsel %vm300_vm0, %v298_v8, 0.0 }
  0xaa   : > { %v320_v5 = vrot.slane %v319_v2, 1  ;;  %v331_v12 = vsel %vm300_vm0, %v297_v3, 0.0 }
  0xab   : > { %v329_v9 = vsel %vm300_vm0, %v296_v4, 0.0 }
  0xac   : > { %v321_v10 = vadd.f32 %v320_v5, %v319_v2  ;;  %v330_v11 = vadd.f32 %v329_v9, %v328_v6  ;;  %v362_v25 = vpop.permute.xlu2 %361 }
  0xae   : > { %v343_v13 = vadd.f32 %v321_v10, %v187_v7  ;;  %v332_v14 = vadd.f32 %v331_v12, %v330_v11  ;;  %v267_v15 = vpop.xlane.xlu0 %266 }
  0xaf   : > { %v283_v17 = vmul.f32 0.00390625, %v267_v15 }
  0xb0   : > { %v345_v18 = vmul.f32 0.01, %v343_v13  ;;  %v334_v21 = vadd.f32 %v333_v16, %v332_v14 }
  0xb1   : > { %v299_v19 = vmul.f32 %v283_v17, %v1414_v55 }
  0xb2   : > { %v347_v20 = vmax.f32 %v343_v13, %v345_v18 }
  0xb3   : > { %v335_v22 = vsel %vm300_vm0, %v299_v19, 0.0  ;;  %v1298_v19 = vmov 18  }
  0xb4   : > { %v349_v23 = vperm.slane %v347_v20, 0  ;;  %v336_v24 = vadd.f32 %v335_v22, %v334_v21  ;;  %v366_v36 = vpop.permute.xlu2 %365  ;;  %1181 = vset.pattern.permute.xlu1 %v1298_v19  ;;  %1182 = vset.pattern.permute.xlu2 %v1298_v19 }
  0xb5   : > { %1180 = vset.pattern.permute.xlu0 %v1298_v19 }
  0xb6   : > { %v384_v26 = vmul.f32 %v362_v25, %v349_v23  ;;  %v337_v27 = vrot.slane %v336_v24, 4  ;;  %v386_v43 = vmul.f32 %v366_v36, %v349_v23 }
  0xb8   : > { %v338_v28 = vadd.f32 %v337_v27, %v336_v24  ;;  %v402_v29 = vsel %vm300_vm0, %v384_v26, 0.0  ;;  %v408_v57 = vsel %vm300_vm0, %v386_v43, 0.0 }
  0xb9   : > { %403 = vadd.xlane.f32.xlu2 %v402_v29 }
  0xba   : > { %v339_v30 = vrot.slane %v338_v28, 2 }
  0xbc   : > { %v340_v31 = vadd.f32 %v339_v30, %v338_v28  ;;  %v372_v58 = vpop.permute.xlu2 %371 }
  0xbd   : > { %v360_v33 = vpop.permute.xlu1 %359  ;;  %v389_v62 = vmul.f32 %v372_v58, %v349_v23 }
  0xbe   : > { %v341_v32 = vrot.slane %v340_v31, 1  ;;  %v383_v34 = vmul.f32 %v360_v33, %v349_v23 }
  0xbf   : > { %v417_v3 = vsel %vm300_vm0, %v389_v62, 0.0 }
  0xc0   : > { %v342_v35 = vadd.f32 %v341_v32, %v340_v31  ;;  %v399_v38 = vsel %vm300_vm0, %v383_v34, 0.0 }
  0xc1   : > { %v364_v37 = vpop.permute.xlu0 %363  ;;  %400 = vadd.xlane.f32.xlu0 %v399_v38 }
  0xc2   : > { %v344_v39 = vadd.f32 %v342_v35, %v187_v7  ;;  %v385_v40 = vmul.f32 %v364_v37, %v349_v23  ;;  %v1299_v35 = vmov 16  }
  0xc4   : > { %v405_v41 = vsel %vm300_vm0, %v385_v40, 0.0  ;;  %v346_v42 = vmul.f32 0.01, %v344_v39 }
  0xc5   : > { %406 = vadd.xlane.f32.xlu1 %v405_v41  ;;  %v368_v44 = vpop.permute.xlu1 %367 }
  0xc6   : > { %v387_v45 = vmul.f32 %v368_v44, %v349_v23  ;;  %v348_v46 = vmax.f32 %v344_v39, %v346_v42 }
  0xc8   : > { %v411_v56 = vsel %vm300_vm0, %v387_v45, 0.0  ;;  %v350_v60 = vperm.slane %v348_v46, 0 }
  0xc9   : > { %v370_v47 = vpop.permute.xlu0 %369  ;;  %412 = vadd.xlane.f32.xlu2 %v411_v56  ;;  %409 = vadd.xlane.f32.xlu0 %v408_v57 }
  0xca   : > { %v388_v59 = vmul.f32 %v370_v47, %v349_v23  ;;  %v391_v1 = vmul.f32 %v360_v33, %v350_v60  ;;  %v393_v4 = vmul.f32 %v364_v37, %v350_v60  ;;  %v392_v6 = vmul.f32 %v362_v25, %v350_v60 }
  0xcb   : > { %v394_v7 = vmul.f32 %v366_v36, %v350_v60  ;;  %v396_v10 = vmul.f32 %v370_v47, %v350_v60  ;;  %v395_v12 = vmul.f32 %v368_v44, %v350_v60  ;;  %v397_v13 = vmul.f32 %v372_v58, %v350_v60 }
  0xcc   : > { %v414_v61 = vsel %vm300_vm0, %v388_v59, 0.0  ;;  %v423_v5 = vsel %vm300_vm0, %v391_v1, 0.0  ;;  %v429_v8 = vsel %vm300_vm0, %v393_v4, 0.0  ;;  %v426_v9 = vsel %vm300_vm0, %v392_v6, 0.0 }
  0xcd   : > { %415 = vadd.xlane.f32.xlu1 %v414_v61  ;;  %v374_v63 = vpop.permute.xlu1 %373  ;;  %v432_v11 = vsel %vm300_vm0, %v394_v7, 0.0  ;;  %v438_v14 = vsel %vm300_vm0, %v396_v10, 0.0  ;;  %v435_v15 = vsel %vm300_vm0, %v395_v12, 0.0  ;;  %v441_v16 = vsel %vm300_vm0, %v397_v13, 0.0 }
  0xce   : > { %v390_v0 = vmul.f32 %v374_v63, %v349_v23  ;;  %v398_v17 = vmul.f32 %v374_v63, %v350_v60 }
  0xd0   : > { %v420_v2 = vsel %vm300_vm0, %v390_v0, 0.0  ;;  %v444_v18 = vsel %vm300_vm0, %v398_v17, 0.0 }
  0xd1   : > { %421 = vadd.xlane.f32.xlu2 %v420_v2  ;;  %418 = vadd.xlane.f32.xlu0 %v417_v3 }
  0xd5   : > { %424 = vadd.xlane.f32.xlu1 %v423_v5 }
  0xd9   : > { %430 = vadd.xlane.f32.xlu2 %v429_v8  ;;  %427 = vadd.xlane.f32.xlu0 %v426_v9 }
  0xdd   : > { %433 = vadd.xlane.f32.xlu1 %v432_v11 }
  0xe1   : > { %439 = vadd.xlane.f32.xlu2 %v438_v14  ;;  %436 = vadd.xlane.f32.xlu0 %v435_v15 }
  0xe5   : > { %442 = vadd.xlane.f32.xlu1 %v441_v16 }
  0xe9   : > { %445 = vadd.xlane.f32.xlu0 %v444_v18 }
  0xf9   : > { %767 = vrot.lane.b32.xlu2 %v1378_v49, %s1297_s11 }
  0xfd   : > { %771 = vrot.lane.b32.xlu0 %v1385_v50, %s1297_s11 }
  0xfe   : > { %769 = vrot.lane.b32.xlu1 %v1373_v48, %s1297_s11 }
 0x101   : > { %773 = vrot.lane.b32.xlu2 %v1391_v51, %s1297_s11 }
 0x105   : > { %775 = vrot.lane.b32.xlu0 %v1396_v52, %s1297_s11 }
 0x106   : > { %777 = vrot.lane.b32.xlu1 %v1403_v53, %s1297_s11 }
 0x109   : > { %779 = vrot.lane.b32.xlu2 %v1409_v54, %s1297_s11 }
 0x10d   : > { %781 = vrot.lane.b32.xlu0 %v1414_v55, %s1297_s11 }
 0x10e   : > { %924 = vperm.xlu1 %1181, %v1373_v48  }
 0x111   : > { %928 = vperm.xlu2 %1182, %v1385_v50  }
 0x115   : > { %920 = vperm.xlu0 %1180, %v1378_v49  }
 0x116   : > { %932 = vperm.xlu1 %1181, %v1391_v51  }
 0x119   : > { %936 = vperm.xlu2 %1182, %v1396_v52  }
 0x11d   : > { %1185 = vset.pattern.permute.xlu0 %v1299_v35 }
 0x11e   : > { %1183 = vset.pattern.permute.xlu1 %v1299_v35 }
 0x121   : > { %1184 = vset.pattern.permute.xlu2 %v1299_v35 }
 0x12c   : > { %v404_v20 = vpop.xlane.xlu2 %403 }
 0x12d   : > { %v448_v25 = vadd.f32 %v404_v20, %v1373_v48 }
 0x12f   : > { %v1149_v27 = vmul.f32 -1.442695, %v448_v25 }
 0x134   : > { %v401_v21 = vpop.xlane.xlu0 %400 }
 0x135   : > { %v447_v22 = vadd.f32 %v401_v21, %v1378_v49 }
 0x137   : > { %v1148_v23 = vmul.f32 -1.442695, %v447_v22 }
 0x138   : > { %v407_v24 = vpop.xlane.xlu1 %406 }
 0x139   : > { %1189 = vpow2.f32 %v1148_v23  ;;  %v449_v29 = vadd.f32 %v407_v24, %v1385_v50 }
 0x13a   : > { %1191 = vpow2.f32 %v1149_v27 }
 0x13b   : > { %v1150_v36 = vmul.f32 -1.442695, %v449_v29 }
 0x13c   : > { %v413_v26 = vpop.xlane.xlu2 %412  ;;  %v410_v28 = vpop.xlane.xlu0 %409 }
 0x13d   : > { %v450_v30 = vadd.f32 %v410_v28, %v1391_v51  ;;  %v451_v0 = vadd.f32 %v413_v26, %v1396_v52 }
 0x13f   : > { %v1190_v31 = vpop.eup %1189  ;;  %v1151_v32 = vmul.f32 -1.442695, %v450_v30  ;;  %v1152_v10 = vmul.f32 -1.442695, %v451_v0 }
 0x140   : > { %v416_v33 = vpop.xlane.xlu1 %415  ;;  %v1489_v34 = vadd.f32 1.0, %v1190_v31  ;;  %v1192_v38 = vpop.eup %1191 }
 0x141   : > { %1193 = vpow2.f32 %v1151_v32  ;;  %v1494_v43 = vadd.f32 1.0, %v1192_v38  ;;  %v452_v58 = vadd.f32 %v416_v33, %v1403_v53 }
 0x142   : > { %1195 = vrcp.f32 %v1489_v34  ;;  %v538_v12 = vand.u32 2147483648, %v1489_v34  ;;  %vm532_vm2 = vweird.f32 %v1489_v34  ;;  %v536_v13 = vand.u32 2147483647, %v1489_v34 }
 0x143   : > { %1197 = vpow2.f32 %v1150_v36  ;;  %v1153_v1 = vmul.f32 -1.442695, %v452_v58  ;;  %vm547_vm10 = vweird.f32 %v1494_v43 }
 0x144   : > { %v422_v37 = vpop.xlane.xlu2 %421  ;;  %v419_v44 = vpop.xlane.xlu0 %418  ;;  %v539_v25 = vor.u32 1.1754944e-38, %v538_v12  ;;  %vm537_vm4 = vcmp.eq.f32.partialorder %v536_v13, 8.507059e+37 }
 0x145   : > { %v453_v61 = vadd.f32 %v419_v44, %v1409_v54  ;;  %v454_v11 = vadd.f32 %v422_v37, %v1414_v55 }
 0x147   : > { %v1194_v39 = vpop.eup %1193  ;;  %v1154_v3 = vmul.f32 -1.442695, %v453_v61  ;;  %v1155_v22 = vmul.f32 -1.442695, %v454_v11 }
 0x148   : > { %v425_v40 = vpop.xlane.xlu1 %424  ;;  %v1196_v41 = vpop.eup %1195  ;;  %v1492_v42 = vadd.f32 1.0, %v1194_v39 }
 0x149   : > { %v455_v45 = vadd.f32 %v425_v40, %v1378_v49  ;;  %v528_v46 = vmul.f32 %v1196_v41, %v1489_v34  ;;  %v1198_v47 = vpop.eup %1197  ;;  %vm533_vm1 = vweird.f32 %v1196_v41 }
 0x14a   : > { %1199 = vrcp.f32 %v1492_v42  ;;  %v1501_v60 = vadd.f32 1.0, %v1198_v47  ;;  %vm1520_vm3 = vmor %vm532_vm2, %vm533_vm1  ;;  %v583_v37 = vand.u32 2147483648, %v1492_v42  ;;  %vm577_vm6 = vweird.f32 %v1492_v42 }
 0x14b   : > { %v529_v57 = vsub.f32 1.0, %v528_v46  ;;  %1201 = vrcp.f32 %v1494_v43  ;;  %v1156_v59 = vmul.f32 -1.442695, %v455_v45  ;;  %v581_v39 = vand.u32 2147483647, %v1492_v42 }
 0x14c   : > { %v431_v56 = vpop.xlane.xlu2 %430  ;;  %v428_v5 = vpop.xlane.xlu0 %427  ;;  %vm562_vm14 = vweird.f32 %v1501_v60 }
 0x14d   : > { %v530_v49 = vmul.f32 %v1196_v41, %v529_v57  ;;  %1203 = vpow2.f32 %v1156_v59  ;;  %v457_v23 = vadd.f32 %v431_v56, %v1385_v50  ;;  %v584_v56 = vor.u32 1.1754944e-38, %v583_v37 }
 0x14e   : > { %1205 = vrcp.f32 %v1501_v60  ;;  %v551_v57 = vand.u32 2147483647, %v1494_v43  ;;  %vm582_vm8 = vcmp.eq.f32.partialorder %v581_v39, 8.507059e+37  ;;  %v553_v59 = vand.u32 2147483648, %v1494_v43 }
 0x14f   : > { %v531_v8 = vadd.f32 %v1196_v41, %v530_v49  ;;  %1207 = vpow2.f32 %v1153_v1  ;;  %v1158_v35 = vmul.f32 -1.442695, %v457_v23 }
 0x150   : > { %v434_v62 = vpop.xlane.xlu1 %433  ;;  %v1504_v63 = vpop.eup %1199  ;;  %1209 = vpow2.f32 %v1154_v3  ;;  %vm1584_vm12 = vcmp.eq.f32.partialorder %v551_v57, 8.507059e+37 }
 0x151   : > { %v573_v2 = vmul.f32 %v1504_v63, %v1492_v42  ;;  %v1510_v4 = vpop.eup %1201  ;;  %v458_v7 = vadd.f32 %v434_v62, %v1391_v51  ;;  %v456_v51 = vadd.f32 %v428_v5, %v1373_v48  ;;  %v535_v20 = vsel %vm1520_vm3, %v1196_v41, %v531_v8 }
 0x152   : > { %v543_v14 = vmul.f32 %v1510_v4, %v1494_v43  ;;  %1211 = vpow2.f32 %v1152_v10  ;;  %v540_v30 = vsel %vm537_vm4, %v539_v25, %v535_v20  ;;  %vm578_vm5 = vweird.f32 %v1504_v63 }
 0x153   : > { %v574_v9 = vsub.f32 1.0, %v573_v2  ;;  %v1204_v15 = vpop.eup %1203  ;;  %v1159_v18 = vmul.f32 -1.442695, %v458_v7  ;;  %v1157_v28 = vmul.f32 -1.442695, %v456_v51  ;;  %vm1550_vm7 = vmor %vm577_vm6, %vm578_vm5  ;;  %vm548_vm9 = vweird.f32 %v1510_v4 }
 0x154   : > { %v440_v6 = vpop.xlane.xlu2 %439  ;;  %v1524_v17 = vpop.eup %1205  ;;  %v1530_v26 = vadd.f32 1.0, %v1204_v15  ;;  %v544_v48 = vsub.f32 1.0, %v543_v14  ;;  %vm1580_vm11 = vmor %vm547_vm10, %vm548_vm9  ;;  %v554_v10 = vor.u32 1.1754944e-38, %v553_v59  ;;  %v568_v15 = vand.u32 2147483648, %v1501_v60 }
 0x155   : > { %v575_v21 = vmul.f32 %v1504_v63, %v574_v9  ;;  %v1208_v27 = vpop.eup %1207  ;;  %v558_v31 = vmul.f32 %v1524_v17, %v1501_v60  ;;  %1213 = vpow2.f32 %v1159_v18  ;;  %v437_v36 = vpop.xlane.xlu0 %436  ;;  %v460_v46 = vadd.f32 %v440_v6, %v1403_v53 }
 0x156   : > { %v1210_v32 = vpop.eup %1209  ;;  %1215 = vpow2.f32 %v1155_v22  ;;  %v1541_v38 = vadd.f32 1.0, %v1208_v27  ;;  %v545_v41 = vmul.f32 %v1510_v4, %v544_v48  ;;  %v459_v2 = vadd.f32 %v437_v36, %v1396_v52 }
 0x157   : > { %v576_v34 = vadd.f32 %v1504_v63, %v575_v21  ;;  %1217 = vrcp.f32 %v1530_v26  ;;  %v1546_v40 = vadd.f32 1.0, %v1210_v32  ;;  %v559_v44 = vsub.f32 1.0, %v558_v31 }
 0x158   : > { %v443_v24 = vpop.xlane.xlu1 %442  ;;  %v1212_v45 = vpop.eup %1211  ;;  %1219 = vpow2.f32 %v1157_v28  ;;  %v1161_v1 = vmul.f32 -1.442695, %v460_v46  ;;  %v566_v6 = vand.u32 2147483647, %v1501_v60  ;;  %v1160_v16 = vmul.f32 -1.442695, %v459_v2 }
 0x159   : > { %v461_v50 = vadd.f32 %v443_v24, %v1409_v54  ;;  %v580_v42 = vsel %vm1550_vm7, %v1504_v63, %v576_v34  ;;  %1221 = vpow2.f32 %v1158_v35  ;;  %v546_v63 = vadd.f32 %v1510_v4, %v545_v41 }
 0x15a   : > { %1223 = vrcp.f32 %v1541_v38  ;;  %v585_v62 = vsel %vm582_vm8, %v584_v56, %v580_v42  ;;  %v560_v49 = vmul.f32 %v1524_v17, %v559_v44  ;;  %v1576_v8 = vadd.f32 1.0, %v1212_v45 }
 0x15b   : > { %v1162_v47 = vmul.f32 -1.442695, %v461_v50  ;;  %v1214_v58 = vpop.eup %1213  ;;  %1225 = vrcp.f32 %v1546_v40  ;;  %v550_v14 = vsel %vm1580_vm11, %v1510_v4, %v546_v63  ;;  %vm563_vm13 = vweird.f32 %v1524_v17 }
 0x15c   : > { %v1532_v29 = vpop.permute.xlu2 %767  ;;  %v1216_v61 = vpop.eup %1215  ;;  %v1572_v5 = vadd.f32 1.0, %v1214_v58  ;;  %v561_v18 = vadd.f32 %v1524_v17, %v560_v49  ;;  %vm1606_vm15 = vcmp.eq.f32.partialorder %v566_v6, 8.507059e+37  ;;  %v555_v24 = vsel %vm1584_vm12, %v554_v10, %v550_v14  ;;  %vm1617_vm0 = vmor %vm562_vm14, %vm563_vm13 }
 0x15d   : > { %v791_v33 = vmul.f32 %v1532_v29, %v540_v30  ;;  %v1568_v0 = vpop.eup %1217  ;;  %1227 = vpow2.f32 %v1162_v47  ;;  %v1588_v12 = vadd.f32 1.0, %v1216_v61  ;;  %v446_v13 = vpop.xlane.xlu0 %445  ;;  %v611_v25 = vand.u32 2147483647, %v1541_v38 }
 0x15e   : > { %v1220_v7 = vpop.eup %1219  ;;  %v648_v43 = vmul.f32 %v1568_v0, %v1530_v26  ;;  %1229 = vpow2.f32 %v1161_v1  ;;  %v569_v60 = vor.u32 1.1754944e-38, %v568_v15  ;;  %v462_v30 = vadd.f32 %v446_v13, %v1414_v55 }
 0x15f   : > { %809 = vperm.xlu1 %1183, %v791_v33   ;;  %v1222_v11 = vpop.eup %1221  ;;  %v1602_v21 = vadd.f32 1.0, %v1220_v7  ;;  %1231 = vrcp.f32 %v1572_v5  ;;  %v565_v32 = vsel %vm1617_vm0, %v1524_v17, %v561_v18  ;;  %vm607_vm1 = vweird.f32 %v1541_v38 }
 0x160   : > { %v1596_v51 = vpop.eup %1223  ;;  %1233 = vrcp.f32 %v1576_v8  ;;  %v1611_v23 = vadd.f32 1.0, %v1222_v11  ;;  %v649_v48 = vsub.f32 1.0, %v648_v43  ;;  %v656_v35 = vand.u32 2147483647, %v1530_v26 }
 0x161   : > { %v1600_v20 = vpop.eup %1225  ;;  %1235 = vrcp.f32 %v1588_v12  ;;  %v603_v28 = vmul.f32 %v1596_v51, %v1541_v38  ;;  %v658_v55 = vand.u32 2147483648, %v1530_v26  ;;  %v626_v36 = vand.u32 2147483647, %v1546_v40 }
 0x162   : > { %1237 = vpow2.f32 %v1160_v16  ;;  %v618_v31 = vmul.f32 %v1600_v20, %v1546_v40  ;;  %vm1637_vm2 = vcmp.eq.f32.partialorder %v611_v25, 8.507059e+37  ;;  %v650_v39 = vmul.f32 %v1568_v0, %v649_v48 }
 0x163   : > { %v1228_v22 = vpop.eup %1227  ;;  %1239 = vrcp.f32 %v1602_v21  ;;  %v604_v33 = vsub.f32 1.0, %v603_v28  ;;  %v628_v54 = vand.u32 2147483648, %v1546_v40  ;;  %v570_v44 = vsel %vm1606_vm15, %v569_v60, %v565_v32 }
 0x164   : > { %v1564_v53 = vpop.permute.xlu2 %773  ;;  %v1630_v50 = vadd.f32 1.0, %v1228_v22  ;;  %v1230_v34 = vpop.eup %1229  ;;  %1241 = vrcp.f32 %v1611_v23  ;;  %v1163_v42 = vmul.f32 -1.442695, %v462_v30  ;;  %v619_v56 = vsub.f32 1.0, %v618_v31 }
 0x165   : > { %v794_v3 = vmul.f32 %v1564_v53, %v585_v62  ;;  %v1641_v17 = vpop.eup %1231  ;;  %v605_v46 = vmul.f32 %v1596_v51, %v604_v33  ;;  %vm608_vm3 = vweird.f32 %v1596_v51  ;;  %v613_v62 = vand.u32 2147483648, %v1541_v38 }
 0x166   : > { %v1652_v47 = vpop.eup %1233  ;;  %1243 = vrcp.f32 %v1630_v50  ;;  %v1662_v49 = vadd.f32 1.0, %v1230_v34  ;;  %vm652_vm4 = vweird.f32 %v1530_v26  ;;  %vm1665_vm5 = vcmp.eq.f32.partialorder %v656_v35, 8.507059e+37  ;;  %vm1681_vm7 = vmor %vm607_vm1, %vm608_vm3 }
 0x167   : > { %824 = vperm.xlu1 %1183, %v794_v3   ;;  %v1656_v58 = vpop.eup %1235  ;;  %v606_v61 = vadd.f32 %v1596_v51, %v605_v46  ;;  %v693_v2 = vmul.f32 %v1641_v17, %v1572_v5  ;;  %v651_v6 = vadd.f32 %v1568_v0, %v650_v39  ;;  %vm653_vm6 = vweird.f32 %v1568_v0 }
 0x168   : > { %v1238_v63 = vpop.eup %1237  ;;  %v659_v7 = vor.u32 1.1754944e-38, %v658_v55  ;;  %v1675_v9 = vor.u32 1.1754944e-38, %v628_v54  ;;  %1245 = vpow2.f32 %v1163_v42  ;;  %vm623_vm8 = vweird.f32 %v1600_v20  ;;  %vm1703_vm9 = vmor %vm652_vm4, %vm653_vm6 }
 0x169   : > { %v1671_v3 = vpop.eup %1239  ;;  %v671_v11 = vand.u32 2147483647, %v1602_v21  ;;  %v610_v43 = vsel %vm1681_vm7, %v1596_v51, %v606_v61  ;;  %v588_v13 = vmul.f32 %v1652_v47, %v1576_v8  ;;  %v1694_v14 = vadd.f32 1.0, %v1238_v63 }
 0x16a   : > { %v1685_v10 = vpop.eup %1241  ;;  %v701_v38 = vand.u32 2147483647, %v1572_v5  ;;  %v620_v15 = vmul.f32 %v1600_v20, %v619_v56  ;;  %v614_v16 = vor.u32 1.1754944e-38, %v613_v62  ;;  %1247 = vrcp.f32 %v1662_v49 }
 0x16b   : > { %v694_v51 = vsub.f32 1.0, %v693_v2  ;;  %vm622_vm10 = vweird.f32 %v1546_v40  ;;  %v663_v4 = vmul.f32 %v1671_v3, %v1602_v21  ;;  %v589_v22 = vsub.f32 1.0, %v588_v13 }
 0x16c   : > { %v655_v25 = vsel %vm1703_vm9, %v1568_v0, %v651_v6  ;;  %v678_v26 = vmul.f32 %v1685_v10, %v1611_v23  ;;  %v615_v48 = vsel %vm1637_vm2, %v614_v16, %v610_v43  ;;  %v598_v60 = vand.u32 2147483648, %v1576_v8  ;;  %vm1770_vm4 = vmor %vm622_vm10, %vm623_vm8 }
 0x16d   : > { %v590_v30 = vmul.f32 %v1652_v47, %v589_v22  ;;  %vm593_vm11 = vweird.f32 %v1652_v47  ;;  %v596_v31 = vand.u32 2147483647, %v1576_v8  ;;  %1249 = vrcp.f32 %v1694_v14 }
 0x16e   : > { %vm697_vm12 = vweird.f32 %v1572_v5  ;;  %v703_v0 = vand.u32 2147483648, %v1572_v5  ;;  %v673_v33 = vand.u32 2147483648, %v1602_v21  ;;  %v695_v35 = vmul.f32 %v1641_v17, %v694_v51 }
 0x16f   : > { %v1649_v45 = vpop.permute.xlu0 %771  ;;  %vm1735_vm13 = vcmp.eq.f32.partialorder %v626_v36, 8.507059e+37  ;;  %v591_v39 = vadd.f32 %v1652_v47, %v590_v30  ;;  %vm592_vm14 = vweird.f32 %v1576_v8  ;;  %v660_v54 = vsel %vm1665_vm5, %v659_v7, %v655_v25 }
 0x170   : > { %v1645_v41 = vpop.permute.xlu1 %769  ;;  %v793_v59 = vmul.f32 %v1649_v45, %v570_v44  ;;  %v621_v44 = vadd.f32 %v1600_v20, %v620_v15  ;;  %vm594_vm15 = vmor %vm592_vm14, %vm593_vm11  ;;  %v599_v36 = vor.u32 1.1754944e-38, %v598_v60  ;;  %v633_v46 = vmul.f32 %v1656_v58, %v1588_v12 }
 0x171   : > { %v792_v57 = vmul.f32 %v1645_v41, %v555_v24  ;;  %v1710_v24 = vpop.eup %1243  ;;  %vm1752_vm0 = vcmp.eq.f32.partialorder %v701_v38, 8.507059e+37  ;;  %v664_v8 = vsub.f32 1.0, %v663_v4  ;;  %vm597_vm1 = vcmp.eq.f32.partialorder %v596_v31, 8.507059e+37 }
 0x172   : > { %819 = vperm.xlu0 %1185, %v793_v59   ;;  %v1246_v34 = vpop.eup %1245  ;;  %v738_v37 = vmul.f32 %v1710_v24, %v1630_v50  ;;  %v595_v59 = vsel %vm594_vm15, %v1652_v47, %v591_v39  ;;  %vm698_vm2 = vweird.f32 %v1641_v17  ;;  %v634_v63 = vsub.f32 1.0, %v633_v46 }
 0x173   : > { %814 = vperm.xlu2 %1184, %v792_v57   ;;  %v1750_v42 = vpop.eup %1247  ;;  %v679_v57 = vsub.f32 1.0, %v678_v26  ;;  %v1757_v61 = vadd.f32 1.0, %v1246_v34  ;;  %v600_v62 = vsel %vm597_vm1, %v599_v36, %v595_v59  ;;  %v696_v1 = vadd.f32 %v1641_v17, %v695_v35  ;;  %vm1788_vm6 = vmor %vm697_vm12, %vm698_vm2 }
 0x174   : > { %v739_v2 = vsub.f32 1.0, %v738_v37  ;;  %vm667_vm3 = vweird.f32 %v1602_v21  ;;  %v643_v7 = vand.u32 2147483648, %v1588_v12  ;;  %v1764_v52 = vpop.eup %1249  ;;  %v704_v43 = vor.u32 1.1754944e-38, %v703_v0 }
 0x175   : > { %v635_v13 = vmul.f32 %v1656_v58, %v634_v63  ;;  %vm638_vm5 = vweird.f32 %v1656_v58  ;;  %v641_v38 = vand.u32 2147483647, %v1588_v12  ;;  %v799_v15 = vmul.f32 %v1532_v29, %v660_v54  ;;  %v1259_v54 = vld [vmem:[%s1336_s18 + $0x8] sm:$0xff] }
 0x176   : > { %v625_v16 = vsel %vm1770_vm4, %v1600_v20, %v621_v44  ;;  %v665_v18 = vmul.f32 %v1671_v3, %v664_v8  ;;  %v680_v40 = vmul.f32 %v1685_v10, %v679_v57  ;;  %1251 = vrcp.f32 %v1757_v61 }
 0x177   : > { %v1726_v32 = vpop.permute.xlu0 %775  ;;  %v723_v29 = vmul.f32 %v1750_v42, %v1662_v49  ;;  %v636_v20 = vadd.f32 %v1656_v58, %v635_v13  ;;  %vm637_vm7 = vweird.f32 %v1588_v12  ;;  %v700_v4 = vsel %vm1788_vm6, %v1641_v17, %v696_v1 }
 0x178   : > { %v1719_v27 = vpop.permute.xlu1 %777  ;;  %v795_v6 = vmul.f32 %v1726_v32, %v600_v62  ;;  %v740_v22 = vmul.f32 %v1710_v24, %v739_v2  ;;  %v708_v5 = vmul.f32 %v1764_v52, %v1694_v14  ;;  %vm639_vm8 = vmor %vm637_vm7, %vm638_vm5  ;;  %v644_v25 = vor.u32 1.1754944e-38, %v643_v7 }
 0x179   : > { %v796_v28 = vmul.f32 %v1719_v27, %v615_v48  ;;  %v780_v48 = vpop.permute.xlu2 %779  ;;  %v630_v12 = vsel %vm1735_vm13, %v1675_v9, %v625_v16  ;;  %vm668_vm9 = vweird.f32 %v1671_v3  ;;  %v640_v17 = vsel %vm639_vm8, %v1656_v58, %v636_v20 }
 0x17a   : > { %vm642_vm10 = vcmp.eq.f32.partialorder %v641_v38, 8.507059e+37  ;;  %v666_v60 = vadd.f32 %v1671_v3, %v665_v18  ;;  %vm683_vm11 = vweird.f32 %v1685_v10  ;;  %v705_v31 = vsel %vm1752_vm0, %v704_v43, %v700_v4  ;;  %vm1827_vm13 = vmor %vm667_vm3, %vm668_vm9 }
 0x17b   : > { %834 = vperm.xlu1 %1183, %v796_v28   ;;  %829 = vperm.xlu2 %1184, %v795_v6   ;;  %v688_v28 = vand.u32 2147483648, %v1611_v23  ;;  %v645_v30 = vsel %vm642_vm10, %v644_v25, %v640_v17  ;;  %v681_v0 = vadd.f32 %v1685_v10, %v680_v40  ;;  %v724_v34 = vsub.f32 1.0, %v723_v29  ;;  %v1255_v25 = vld [vmem:[%s2014_s1 + $0x38] sm:$0xff] }
 0x17c   : > { %v741_v35 = vadd.f32 %v1710_v24, %v740_v22  ;;  %vm743_vm12 = vweird.f32 %v1710_v24  ;;  %v797_v58 = vmul.f32 %v780_v48, %v630_v12  ;;  %v709_v55 = vsub.f32 1.0, %v708_v5  ;;  %v1820_v37 = vpop.eup %1251 }
 0x17d   : > { %v748_v39 = vand.u32 2147483648, %v1630_v50  ;;  %vm682_vm14 = vweird.f32 %v1611_v23  ;;  %v686_v44 = vand.u32 2147483647, %v1611_v23  ;;  %v802_v36 = vmul.f32 %v1564_v53, %v705_v31 }
 0x17e   : > { %vm742_vm15 = vweird.f32 %v1630_v50  ;;  %v746_v46 = vand.u32 2147483647, %v1630_v50  ;;  %v670_v56 = vsel %vm1827_vm13, %v1671_v3, %v666_v60  ;;  %vm1841_vm0 = vmor %vm682_vm14, %vm683_vm11  ;;  %vm672_vm2 = vcmp.eq.f32.partialorder %v671_v11, 8.507059e+37 }
 0x17f   : > { %v1804_v26 = vpop.permute.xlu0 %781  ;;  %vm1847_vm1 = vmor %vm742_vm15, %vm743_vm12  ;;  %v674_v53 = vor.u32 1.1754944e-38, %v673_v33  ;;  %v685_v50 = vsel %vm1841_vm0, %v1685_v10, %v681_v0  ;;  %v725_v3 = vmul.f32 %v1750_v42, %v724_v34  ;;  %v689_v59 = vor.u32 1.1754944e-38, %v688_v28  ;;  %v1256_v28 = vld [vmem:[%s1336_s18 + $0x10] sm:$0xff] }
 0x180   : > { %v798_v9 = vmul.f32 %v1804_v26, %v645_v30  ;;  %v745_v57 = vsel %vm1847_vm1, %v1710_v24, %v741_v35  ;;  %v710_v62 = vmul.f32 %v1764_v52, %v709_v55  ;;  %v753_v63 = vmul.f32 %v1820_v37, %v1757_v61  ;;  %v1903_v12 = vpop.permute.xlu1 %924 }
 0x181   : > { %v749_v11 = vor.u32 1.1754944e-38, %v748_v39  ;;  %v675_v21 = vsel %vm672_vm2, %v674_v53, %v670_v56  ;;  %vm687_vm3 = vcmp.eq.f32.partialorder %v686_v44, 8.507059e+37  ;;  %vm747_vm4 = vcmp.eq.f32.partialorder %v746_v46, 8.507059e+37 }
 0x182   : > { %844 = vperm.xlu0 %1185, %v798_v9   ;;  %v800_v33 = vmul.f32 %v1645_v41, %v675_v21  ;;  %v690_v10 = vsel %vm687_vm3, %v689_v59, %v685_v50  ;;  %v726_v6 = vadd.f32 %v1750_v42, %v725_v3  ;;  %vm728_vm5 = vweird.f32 %v1750_v42  ;;  %v1260_v59 = vld [vmem:[%s1336_s18 + $0x30] sm:$0xff] }
 0x183   : > { %849 = vperm.xlu1 %1183, %v799_v15   ;;  %839 = vperm.xlu2 %1184, %v797_v58   ;;  %v750_v1 = vsel %vm747_vm4, %v749_v11, %v745_v57  ;;  %v801_v2 = vmul.f32 %v1649_v45, %v690_v10  ;;  %v733_v24 = vand.u32 2147483648, %v1662_v49  ;;  %v711_v7 = vadd.f32 %v1764_v52, %v710_v62 }
 0x184   : > { %vm713_vm6 = vweird.f32 %v1764_v52  ;;  %v754_v43 = vsub.f32 1.0, %v753_v63  ;;  %vm727_vm7 = vweird.f32 %v1662_v49  ;;  %v731_v47 = vand.u32 2147483647, %v1662_v49  ;;  %v1261_v63 = vld [vmem:[%s1336_s18 + $0x38] sm:$0xff] }
 0x185   : > { %v718_v41 = vand.u32 2147483648, %v1694_v14  ;;  %v805_v13 = vmul.f32 %v780_v48, %v750_v1  ;;  %vm729_vm8 = vmor %vm727_vm7, %vm728_vm5  ;;  %vm712_vm9 = vweird.f32 %v1694_v14  ;;  %v716_v45 = vand.u32 2147483647, %v1694_v14  ;;  %v1901_v48 = vpop.permute.xlu2 %928  ;;  %v1263_v1 = vld [vmem:[%s1336_s18 + $0x48] sm:$0xff] }
 0x186   : > { %v730_v38 = vsel %vm729_vm8, %v1750_v42, %v726_v6  ;;  %vm714_vm10 = vmor %vm712_vm9, %vm713_vm6  ;;  %v734_v15 = vor.u32 1.1754944e-38, %v733_v24  ;;  %v755_v18 = vmul.f32 %v1820_v37, %v754_v43  ;;  %vm732_vm11 = vcmp.eq.f32.partialorder %v731_v47, 8.507059e+37 }
 0x187   : > { %v715_v16 = vsel %vm714_vm10, %v1764_v52, %v711_v7  ;;  %v719_v49 = vor.u32 1.1754944e-38, %v718_v41  ;;  %vm717_vm12 = vcmp.eq.f32.partialorder %v716_v45, 8.507059e+37  ;;  %vm758_vm13 = vweird.f32 %v1820_v37  ;;  %v1913_v35 = vpop.permute.xlu0 %920 }
 0x188   : > { %v735_v40 = vsel %vm732_vm11, %v734_v15, %v730_v38  ;;  %v756_v14 = vadd.f32 %v1820_v37, %v755_v18  ;;  %v763_v42 = vand.u32 2147483648, %v1757_v61  ;;  %vm757_vm14 = vweird.f32 %v1757_v61  ;;  %v1907_v17 = vpop.permute.xlu1 %932 }
 0x189   : > { %v804_v51 = vmul.f32 %v1719_v27, %v735_v40  ;;  %v720_v29 = vsel %vm717_vm12, %v719_v49, %v715_v16  ;;  %v761_v52 = vand.u32 2147483647, %v1757_v61  ;;  %vm759_vm15 = vmor %vm757_vm14, %vm758_vm13  ;;  %v1254_v61 = vld [vmem:[%s2014_s1 + $0x28] sm:$0xff] }
 0x18a   : > { %859 = vperm.xlu0 %1185, %v801_v2   ;;  %v803_v20 = vmul.f32 %v1726_v32, %v720_v29  ;;  %v760_v4 = vsel %vm759_vm15, %v1820_v37, %v756_v14  ;;  %v764_v27 = vor.u32 1.1754944e-38, %v763_v42  ;;  %v1253_v32 = vld [vmem:[%s2014_s1 + $0x30] sm:$0xff]  ;;  %v1258_v37 = vld [vmem:[%s1336_s18] sm:$0xff] }
 0x18b   : > { %864 = vperm.xlu1 %1183, %v802_v36   ;;  %854 = vperm.xlu2 %1184, %v800_v33   ;;  %vm762_vm0 = vcmp.eq.f32.partialorder %v761_v52, 8.507059e+37  ;;  %v1262_v33 = vld [vmem:[%s1336_s18 + $0x40] sm:$0xff] }
 0x18c   : > { %v765_v22 = vsel %vm762_vm0, %v764_v27, %v760_v4 }
 0x18d   : > { %v806_v5 = vmul.f32 %v1804_v26, %v765_v22  ;;  %v1905_v26 = vpop.permute.xlu2 %936  ;;  %v1266_v22 = vld [vmem:[%s1336_s18 + $0x90] sm:$0xff] }
 0x192   : > { %874 = vperm.xlu0 %1185, %v804_v51   ;;  %v1264_v51 = vld [vmem:[%s1336_s18 + $0x20] sm:$0xff] }
 0x193   : > { %879 = vperm.xlu1 %1183, %v805_v13   ;;  %869 = vperm.xlu2 %1184, %v803_v20   ;;  %v1265_v20 = vld [vmem:[%s1336_s18 + $0x28] sm:$0xff] }
 0x19a   : > { %1186 = vset.pattern.permute.xlu0 %v1298_v19 }
 0x19b   : > { %1187 = vset.pattern.permute.xlu1 %v1298_v19  ;;  %884 = vperm.xlu2 %1184, %v806_v5  }
 0x19c   : > { %944 = vperm.xlu1 %1187, %v1253_v32   ;;  %940 = vperm.xlu0 %1186, %v1254_v61   ;;  %v1267_v61 = vld [vmem:[%s1336_s18 + $0x98] sm:$0xff] }
 0x1a3   : > { %1188 = vset.pattern.permute.xlu2 %v1298_v19  ;;  %v1257_v19 = vld [vmem:[%s1336_s18 + $0x18] sm:$0xff] }
 0x1a4   : > { %948 = vperm.xlu2 %1188, %v1255_v25  }
 0x1cd   : > { %v815_v60 = vpop.permute.xlu2 %814 }
 0x1ce   : > { %v889_v30 = vmul.f32 %v1256_v28, %v815_v60  ;;  %v890_v31 = vmul.f32 %v1257_v19, %v815_v60 }
 0x1d0   : > { %v953_v0 = vadd.f32 %v1903_v12, %v889_v30  ;;  %v954_v34 = vadd.f32 %v1903_v12, %v890_v31 }
 0x1d1   : > { %v810_v9 = vpop.permute.xlu1 %809 }
 0x1d2   : > { %v985_v58 = vmul.f32 0.01, %v953_v0  ;;  %v986_v55 = vmul.f32 0.01, %v954_v34  ;;  %v887_v39 = vmul.f32 %v1258_v37, %v810_v9  ;;  %v888_v44 = vmul.f32 %v1259_v54, %v810_v9  ;;  %v1268_v37 = vld [vmem:[%s1336_s18 + $0xc0] sm:$0xff]  ;;  %v1269_v54 = vld [vmem:[%s1336_s18 + $0xc8] sm:$0xff] }
 0x1d4   : > { %v1017_v36 = vmax.f32 %v953_v0, %v985_v58  ;;  %v1018_v46 = vmax.f32 %v954_v34, %v986_v55  ;;  %v951_v56 = vadd.f32 %v1913_v35, %v887_v39  ;;  %v952_v8 = vadd.f32 %v1913_v35, %v888_v44 }
 0x1d5   : > { %v830_v21 = vpop.permute.xlu2 %829 }
 0x1d6   : > { %1049 = vst [vmem:[%s1922_s24 + $0x10] sm:$0xff] %v1017_v36  ;;  %v983_v23 = vmul.f32 0.01, %v951_v56  ;;  %v984_v53 = vmul.f32 0.01, %v952_v8  ;;  %v895_v10 = vmul.f32 %v1262_v33, %v830_v21  ;;  %v896_v2 = vmul.f32 %v1263_v1, %v830_v21 }
 0x1d7   : > { %1050 = vst [vmem:[%s1922_s24 + $0x18] sm:$0xff] %v1018_v46 }
 0x1d8   : > { %v1015_v50 = vmax.f32 %v951_v56, %v983_v23  ;;  %v1016_v3 = vmax.f32 %v952_v8, %v984_v53  ;;  %v959_v7 = vadd.f32 %v1905_v26, %v895_v10  ;;  %v960_v43 = vadd.f32 %v1905_v26, %v896_v2  ;;  %v1270_v56 = vld [vmem:[%s1336_s18 + $0x80] sm:$0xff]  ;;  %v1271_v23 = vld [vmem:[%s1336_s18 + $0x88] sm:$0xff] }
 0x1d9   : > { %v825_v57 = vpop.permute.xlu1 %824 }
 0x1da   : > { %1047 = vst [vmem:[%s1922_s24] sm:$0xff] %v1015_v50  ;;  %v893_v62 = vmul.f32 %v1260_v59, %v825_v57  ;;  %v894_v11 = vmul.f32 %v1261_v63, %v825_v57  ;;  %v991_v13 = vmul.f32 0.01, %v959_v7  ;;  %v992_v45 = vmul.f32 0.01, %v960_v43 }
 0x1db   : > { %1048 = vst [vmem:[%s1922_s24 + $0x8] sm:$0xff] %v1016_v3 }
 0x1dc   : > { %v957_v6 = vadd.f32 %v1907_v17, %v893_v62  ;;  %v958_v24 = vadd.f32 %v1907_v17, %v894_v11  ;;  %v1023_v16 = vmax.f32 %v959_v7, %v991_v13  ;;  %v1024_v18 = vmax.f32 %v960_v43, %v992_v45 }
 0x1dd   : > { %v1940_v49 = vpop.permute.xlu2 %839 }
 0x1de   : > { %v989_v47 = vmul.f32 0.01, %v957_v6  ;;  %v990_v41 = vmul.f32 0.01, %v958_v24  ;;  %1055 = vst [vmem:[%s1922_s24 + $0x40] sm:$0xff] %v1023_v16  ;;  %v1275_v16 = vld [vmem:[%s1336_s18 + $0x78] sm:$0xff] }
 0x1df   : > { %1056 = vst [vmem:[%s1922_s24 + $0x48] sm:$0xff] %v1024_v18 }
 0x1e0   : > { %v1021_v38 = vmax.f32 %v957_v6, %v989_v47  ;;  %v1022_v15 = vmax.f32 %v958_v24, %v990_v41  ;;  %v1272_v6 = vld [vmem:[%s1336_s18 + $0xb0] sm:$0xff] }
 0x1e2   : > { %1053 = vst [vmem:[%s1922_s24 + $0x30] sm:$0xff] %v1021_v38  ;;  %v1274_v38 = vld [vmem:[%s1336_s18 + $0x70] sm:$0xff] }
 0x1e3   : > { %1054 = vst [vmem:[%s1922_s24 + $0x38] sm:$0xff] %v1022_v15 }
 0x1e4   : > { %v820_v40 = vpop.permute.xlu0 %819 }
 0x1e5   : > { %v891_v29 = vmul.f32 %v1264_v51, %v820_v40  ;;  %v892_v14 = vmul.f32 %v1265_v20, %v820_v40  ;;  %v855_v4 = vpop.permute.xlu2 %854  ;;  %v1276_v40 = vld [vmem:[%s1336_s18 + $0xa0] sm:$0xff] }
 0x1e6   : > { %v905_v5 = vmul.f32 %v1266_v22, %v855_v4  ;;  %v906_v25 = vmul.f32 %v1267_v61, %v855_v4 }
 0x1e7   : > { %v955_v42 = vadd.f32 %v1901_v48, %v891_v29  ;;  %v956_v52 = vadd.f32 %v1901_v48, %v892_v14  ;;  %v1277_v29 = vld [vmem:[%s1336_s18 + $0xa8] sm:$0xff]  ;;  %v1278_v14 = vld [vmem:[%s1336_s18 + $0xf0] sm:$0xff] }
 0x1e8   : > { %v969_v19 = vadd.f32 %v1903_v12, %v905_v5  ;;  %v970_v31 = vadd.f32 %v1903_v12, %v906_v25 }
 0x1e9   : > { %v987_v27 = vmul.f32 0.01, %v955_v42  ;;  %v988_v32 = vmul.f32 0.01, %v956_v52 }
 0x1ea   : > { %v1001_v0 = vmul.f32 0.01, %v969_v19  ;;  %v1002_v34 = vmul.f32 0.01, %v970_v31 }
 0x1eb   : > { %v1019_v60 = vmax.f32 %v955_v42, %v987_v27  ;;  %v1020_v28 = vmax.f32 %v956_v52, %v988_v32  ;;  %v1279_v52 = vld [vmem:[%s1336_s18 + $0xf8] sm:$0xff] }
 0x1ec   : > { %v1033_v9 = vmax.f32 %v969_v19, %v1001_v0  ;;  %v1034_v58 = vmax.f32 %v970_v31, %v1002_v34 }
 0x1ed   : > { %v1950_v30 = vpop.permute.xlu1 %834  ;;  %1051 = vst [vmem:[%s1922_s24 + $0x20] sm:$0xff] %v1019_v60  ;;  %v870_v55 = vpop.permute.xlu2 %869 }
 0x1ee   : > { %1052 = vst [vmem:[%s1922_s24 + $0x28] sm:$0xff] %v1020_v28  ;;  %v911_v39 = vmul.f32 %v1268_v37, %v870_v55  ;;  %v912_v44 = vmul.f32 %v1269_v54, %v870_v55 }
 0x1ef   : > { %1065 = vst [vmem:[%s1922_s24 + $0x90] sm:$0xff] %v1033_v9 }
 0x1f0   : > { %1066 = vst [vmem:[%s1922_s24 + $0x98] sm:$0xff] %v1034_v58  ;;  %v975_v46 = vadd.f32 %v1905_v26, %v911_v39  ;;  %v976_v12 = vadd.f32 %v1905_v26, %v912_v44 }
 0x1f2   : > { %v1007_v50 = vmul.f32 0.01, %v975_v46  ;;  %v1008_v3 = vmul.f32 0.01, %v976_v12 }
 0x1f4   : > { %v1039_v62 = vmax.f32 %v975_v46, %v1007_v50  ;;  %v1040_v63 = vmax.f32 %v976_v12, %v1008_v3  ;;  %v845_v26 = vpop.permute.xlu0 %844  ;;  %v1280_v12 = vld [vmem:[%s1336_s18 + $0x60] sm:$0xff]  ;;  %v1283_v3 = vld [vmem:[%s1336_s18 + $0xe8] sm:$0xff] }
 0x1f5   : > { %v850_v36 = vpop.permute.xlu1 %849  ;;  %v885_v33 = vpop.permute.xlu2 %884  ;;  %v901_v15 = vmul.f32 %v1274_v38, %v845_v26  ;;  %v902_v18 = vmul.f32 %v1275_v16, %v845_v26 }
 0x1f6   : > { %v903_v8 = vmul.f32 %v1270_v56, %v850_v36  ;;  %v904_v53 = vmul.f32 %v1271_v23, %v850_v36  ;;  %1071 = vst [vmem:[%s1922_s24 + $0xc0] sm:$0xff] %v1039_v62  ;;  %v917_v42 = vmul.f32 %v1278_v14, %v885_v33  ;;  %v918_v4 = vmul.f32 %v1279_v52, %v885_v33 }
 0x1f7   : > { %1072 = vst [vmem:[%s1922_s24 + $0xc8] sm:$0xff] %v1040_v63  ;;  %v899_v56 = vmul.f32 %v1280_v12, %v1940_v49 }
 0x1f8   : > { %v967_v57 = vadd.f32 %v1913_v35, %v903_v8  ;;  %v968_v59 = vadd.f32 %v1913_v35, %v904_v53  ;;  %v1273_v35 = vld [vmem:[%s1336_s18 + $0xb8] sm:$0xff]  ;;  %v1281_v8 = vld [vmem:[%s1336_s18 + $0x68] sm:$0xff]  ;;  %v1282_v53 = vld [vmem:[%s1336_s18 + $0xe0] sm:$0xff] }
 0x1f9   : > { %v900_v23 = vmul.f32 %v1281_v8, %v1940_v49 }
 0x1fa   : > { %v999_v11 = vmul.f32 0.01, %v967_v57  ;;  %v1000_v21 = vmul.f32 0.01, %v968_v59 }
 0x1fc   : > { %v1031_v10 = vmax.f32 %v967_v57, %v999_v11  ;;  %v1032_v1 = vmax.f32 %v968_v59, %v1000_v21  ;;  %v860_v45 = vpop.permute.xlu0 %859 }
 0x1fd   : > { %v865_v2 = vpop.permute.xlu1 %864  ;;  %v907_v51 = vmul.f32 %v1276_v40, %v860_v45  ;;  %v908_v20 = vmul.f32 %v1277_v29, %v860_v45 }
 0x1fe   : > { %1063 = vst [vmem:[%s1922_s24 + $0x80] sm:$0xff] %v1031_v10  ;;  %v909_v24 = vmul.f32 %v1272_v6, %v865_v2  ;;  %v910_v7 = vmul.f32 %v1273_v35, %v865_v2  ;;  %v1284_v10 = vld [vmem:[%s1336_s18 + $0x50] sm:$0xff]  ;;  %v1285_v2 = vld [vmem:[%s1336_s18 + $0x58] sm:$0xff] }
 0x1ff   : > { %1064 = vst [vmem:[%s1922_s24 + $0x88] sm:$0xff] %v1032_v1  ;;  %v971_v22 = vadd.f32 %v1901_v48, %v907_v51  ;;  %v972_v5 = vadd.f32 %v1901_v48, %v908_v20  ;;  %v897_v1 = vmul.f32 %v1284_v10, %v1950_v30  ;;  %v898_v6 = vmul.f32 %v1285_v2, %v1950_v30 }
 0x200   : > { %v973_v43 = vadd.f32 %v1907_v17, %v909_v24  ;;  %v974_v47 = vadd.f32 %v1907_v17, %v910_v7  ;;  %v949_v17 = vpop.permute.xlu2 %948  ;;  %v1286_v24 = vld [vmem:[%s1336_s18 + $0xd0] sm:$0xff] }
 0x201   : > { %v965_v61 = vadd.f32 %v949_v17, %v901_v15  ;;  %v966_v25 = vadd.f32 %v949_v17, %v902_v18  ;;  %v981_v28 = vadd.f32 %v949_v17, %v917_v42  ;;  %v982_v19 = vadd.f32 %v949_v17, %v918_v4 }
 0x202   : > { %v1005_v41 = vmul.f32 0.01, %v973_v43  ;;  %v1006_v13 = vmul.f32 0.01, %v974_v47  ;;  %v1003_v31 = vmul.f32 0.01, %v971_v22 }
 0x203   : > { %v1004_v0 = vmul.f32 0.01, %v972_v5  ;;  %v997_v34 = vmul.f32 0.01, %v965_v61  ;;  %v998_v9 = vmul.f32 0.01, %v966_v25 }
 0x204   : > { %v1037_v27 = vmax.f32 %v973_v43, %v1005_v41  ;;  %v1038_v32 = vmax.f32 %v974_v47, %v1006_v13  ;;  %v1013_v58 = vmul.f32 0.01, %v981_v28  ;;  %v1035_v55 = vmax.f32 %v971_v22, %v1003_v31  ;;  %v875_v44 = vpop.permute.xlu0 %874  ;;  %v1287_v43 = vld [vmem:[%s1336_s18 + $0xd8] sm:$0xff] }
 0x205   : > { %v880_v60 = vpop.permute.xlu1 %879  ;;  %v1036_v48 = vmax.f32 %v972_v5, %v1004_v0  ;;  %v1014_v37 = vmul.f32 0.01, %v982_v19  ;;  %v1029_v39 = vmax.f32 %v965_v61, %v997_v34  ;;  %v1030_v54 = vmax.f32 %v966_v25, %v998_v9 }
 0x206   : > { %1069 = vst [vmem:[%s1922_s24 + $0xb0] sm:$0xff] %v1037_v27  ;;  %v1045_v36 = vmax.f32 %v981_v28, %v1013_v58  ;;  %v915_v50 = vmul.f32 %v1282_v53, %v880_v60  ;;  %v916_v57 = vmul.f32 %v1283_v3, %v880_v60  ;;  %v913_v35 = vmul.f32 %v1286_v24, %v875_v44 }
 0x207   : > { %1070 = vst [vmem:[%s1922_s24 + $0xb8] sm:$0xff] %v1038_v32  ;;  %v1046_v46 = vmax.f32 %v982_v19, %v1014_v37  ;;  %v914_v47 = vmul.f32 %v1287_v43, %v875_v44 }
 0x208   : > { %1067 = vst [vmem:[%s1922_s24 + $0xa0] sm:$0xff] %v1035_v55 }
 0x209   : > { %1068 = vst [vmem:[%s1922_s24 + $0xa8] sm:$0xff] %v1036_v48 }
 0x20a   : > { %1061 = vst [vmem:[%s1922_s24 + $0x70] sm:$0xff] %v1029_v39 }
 0x20b   : > { %1062 = vst [vmem:[%s1922_s24 + $0x78] sm:$0xff] %v1030_v54 }
 0x20c   : > { %1077 = vst [vmem:[%s1922_s24 + $0xf0] sm:$0xff] %v1045_v36 }
 0x20d   : > { %1078 = vst [vmem:[%s1922_s24 + $0xf8] sm:$0xff] %v1046_v46 }
 0x20e   : > { %v945_v59 = vpop.permute.xlu1 %944  ;;  %v941_v38 = vpop.permute.xlu0 %940 }
 0x20f   : > { %v963_v62 = vadd.f32 %v945_v59, %v899_v56  ;;  %v964_v63 = vadd.f32 %v945_v59, %v900_v23  ;;  %v979_v11 = vadd.f32 %v945_v59, %v915_v50  ;;  %v980_v21 = vadd.f32 %v945_v59, %v916_v57 }
 0x210   : > { %v961_v16 = vadd.f32 %v941_v38, %v897_v1  ;;  %v962_v18 = vadd.f32 %v941_v38, %v898_v6  ;;  %v977_v40 = vadd.f32 %v941_v38, %v913_v35  ;;  %v978_v30 = vadd.f32 %v941_v38, %v914_v47 }
 0x211   : > { %v995_v26 = vmul.f32 0.01, %v963_v62  ;;  %v996_v33 = vmul.f32 0.01, %v964_v63  ;;  %v1011_v49 = vmul.f32 0.01, %v979_v11 }
 0x212   : > { %v1012_v7 = vmul.f32 0.01, %v980_v21  ;;  %v993_v51 = vmul.f32 0.01, %v961_v16  ;;  %v994_v29 = vmul.f32 0.01, %v962_v18 }
 0x213   : > { %v1027_v41 = vmax.f32 %v963_v62, %v995_v26  ;;  %v1028_v13 = vmax.f32 %v964_v63, %v996_v33  ;;  %v1043_v45 = vmax.f32 %v979_v11, %v1011_v49  ;;  %v1009_v20 = vmul.f32 0.01, %v977_v40 }
 0x214   : > { %v1044_v15 = vmax.f32 %v980_v21, %v1012_v7  ;;  %v1010_v14 = vmul.f32 0.01, %v978_v30  ;;  %v1025_v42 = vmax.f32 %v961_v16, %v993_v51  ;;  %v1026_v52 = vmax.f32 %v962_v18, %v994_v29 }
 0x215   : > { %1059 = vst [vmem:[%s1922_s24 + $0x60] sm:$0xff] %v1027_v41  ;;  %v1041_v4 = vmax.f32 %v977_v40, %v1009_v20 }
 0x216   : > { %1060 = vst [vmem:[%s1922_s24 + $0x68] sm:$0xff] %v1028_v13  ;;  %v1042_v27 = vmax.f32 %v978_v30, %v1010_v14 }
 0x217   : > { %1075 = vst [vmem:[%s1922_s24 + $0xe0] sm:$0xff] %v1043_v45 }
 0x218   : > { %1076 = vst [vmem:[%s1922_s24 + $0xe8] sm:$0xff] %v1044_v15 }
 0x219   : > { %1057 = vst [vmem:[%s1922_s24 + $0x50] sm:$0xff] %v1025_v42 }
 0x21a   : > { %1058 = vst [vmem:[%s1922_s24 + $0x58] sm:$0xff] %v1026_v52 }
 0x21b   : > { %1073 = vst [vmem:[%s1922_s24 + $0xd0] sm:$0xff] %v1041_v4 }
 0x21c   : > { %1074 = vst [vmem:[%s1922_s24 + $0xd8] sm:$0xff] %v1042_v27 }
 0x21d PF: > { %s13_s12 = sadd.s32 1, %s1294_s12  }
 0x21e   : > { %p10_p4 = scmp.ge.s32.totalorder %s13_s12, 4  }
 0x220   :  { %12 = sbr.rel (!%p10_p4) target bundleno = 1 (0x1), region = 62 }

</bundles_post_ra>
